<compile_context>
chip_gen: v6e
topology: v6e:2x2x1
jax: 0.10.0
libtpu: 0.0.40
codegen_flags: <defaults>
</compile_context>

<pallas_src>
import jax
import jax.numpy as jnp
from jax.experimental import pallas as pl
from jax.experimental.pallas import tpu as pltpu


def _skipper_kernel(scale_ref, x_ref, o_ref):
    # scale_ref: (1,) f32 scalar in SMEM; x_ref/o_ref: VMEM tiles.
    # Multiply in f32, cast once to the output dtype.
    o_ref[...] = (x_ref[...].astype(jnp.float32) * scale_ref[0]).astype(o_ref.dtype)


def _min_sublane(dtype):
    # Minimum second-to-last tile dim per dtype packing (f32:8, bf16:16, int8/fp8:32).
    return {4: 8, 2: 16, 1: 32}.get(jnp.dtype(dtype).itemsize, 8)


def _target_tile_bytes():
    """Generation-aware tile size: ~8 MiB on v7x-class chips, ~4 MiB otherwise."""
    tile_bytes = 4 << 20  # safe / near-roofline on v5e & v6e
    try:
        info = pltpu.get_tpu_info()
        ver = getattr(info, "chip_version", None)
        ver_name = str(getattr(ver, "name", ver)) if ver is not None else ""
        vmem_cap = getattr(info, "vmem_capacity_bytes", 128 << 20)
        # v7x: 64 MiB VMEM per TC but ~3.2 TB/s HBM -> bigger tiles pay off.
        if "7" in ver_name or vmem_cap <= (64 << 20):
            tile_bytes = 8 << 20
    except Exception:
        pass  # unknown platform / query failed: keep the conservative default
    return tile_bytes


def _pick_tile_rows(rows, min_sub, max_tile_rows, min_blocks):
    """Pick a row-tile that is a multiple of `min_sub` (or the full array),
    no larger than `max_tile_rows`, yields >= `min_blocks` grid steps when
    requested, and preferably divides `rows` so every block is full/unmasked."""
    if rows <= min_sub:
        return rows                                   # single full-array block
    if min_blocks <= 1 and rows <= max_tile_rows:
        return rows                                   # fits in one target tile
    upper = max_tile_rows
    if min_blocks > 1:
        upper = min(upper, max(min_sub, rows // min_blocks))
    upper = max(min_sub, (upper // min_sub) * min_sub)
    # Prefer a tile that divides rows evenly -> all blocks full & unmasked.
    if rows % min_sub == 0:
        q = rows // min_sub
        for d in range(upper // min_sub, 0, -1):
            if q % d == 0:
                return d * min_sub
    return upper                                      # partial trailing block (masked)


def skipper_forward(x, alpha, gain, *,
                    target_tile_bytes=None,          # None -> generation-aware default
                    min_split_bytes=128 * 1024,      # split into >=2 blocks above this
                                                     # so both v7x TCs get work
                    min_pallas_elems=1 << 16):
    """x: any-shaped activation (e.g. NCHW). alpha, gain: scalars / 0-d arrays."""
    orig_shape = x.shape
    orig_dtype = x.dtype
    total = x.size
    itemsize = jnp.dtype(orig_dtype).itemsize

    # Scale stays f32 until the final cast (single rounding for narrow dtypes).
    scale_f32 = jnp.asarray(alpha, jnp.float32) * jnp.asarray(gain, jnp.float32)

    # Tiny tensors: kernel launch + pipeline prologue dominate; let XLA fuse it.
    if total < min_pallas_elems:
        return (x.astype(jnp.float32) * scale_f32).astype(orig_dtype)

    # Pick the widest lane (last-dim) width that divides the flattened size so no
    # padding / slicing HBM round trips are needed.  Conv activations whose
    # N*C*H*W is a multiple of 128 (the overwhelmingly common case) hit this path.
    lane = None
    for cand in (1024, 512, 256, 128):
        if total % cand == 0:
            lane = cand
            break
    if lane is None:
        # Remainder path (size not a multiple of 128): the plain XLA elementwise
        # op is already 1 read + 1 write (the roofline), so use it instead of a
        # pad -> kernel -> slice 3-pass detour.
        return (x.astype(jnp.float32) * scale_f32).astype(orig_dtype)

    rows = total // lane
    x2d = jnp.ravel(x).reshape(rows, lane)
    total_bytes = total * itemsize

    if target_tile_bytes is None:
        target_tile_bytes = _target_tile_bytes()

    # Row-tile selection: ~target_tile_bytes per tile, multiple of the dtype's
    # minimum sublane tile, and at least 2 blocks for medium/large inputs so the
    # grid can be sharded across v7x's two TensorCores.
    min_sub = _min_sublane(orig_dtype)
    max_tile_rows = max(min_sub,
                        (target_tile_bytes // (lane * itemsize)) // min_sub * min_sub)
    min_blocks = 2 if total_bytes >= min_split_bytes else 1
    tile_rows = _pick_tile_rows(rows, min_sub, max_tile_rows, min_blocks)

    grid = (pl.cdiv(rows, tile_rows),)

    # VMEM working set = 2x input tile + 2x output tile (default Buffered(2);
    # deeper buffering buys nothing for a pure streaming kernel).  Size the
    # scoped limit to that plus headroom, capped at 48 MiB (< v7x's 64 MiB).
    tile_bytes = tile_rows * lane * itemsize
    vmem_limit = min(4 * tile_bytes + (16 << 20), 48 << 20)

    out2d = pl.pallas_call(
        _skipper_kernel,
        out_shape=jax.ShapeDtypeStruct((rows, lane), orig_dtype),
        grid=grid,
        in_specs=[
            pl.BlockSpec(memory_space=pltpu.SMEM),                # (1,) f32 scale
            pl.BlockSpec((tile_rows, lane), lambda i: (i, 0)),    # input tile
        ],
        out_specs=pl.BlockSpec((tile_rows, lane), lambda i: (i, 0)),
        compiler_params=pltpu.CompilerParams(
            dimension_semantics=("parallel",),
            vmem_limit_bytes=int(vmem_limit),
        ),
        # Advise XLA that this custom call is pure HBM streaming.
        cost_estimate=pl.CostEstimate(
            flops=total, transcendentals=0, bytes_accessed=2 * total_bytes),
    )(scale_f32.reshape((1,)), x2d)

    return out2d.reshape(orig_shape)


if __name__ == "__main__":
    key = jax.random.PRNGKey(0)
    k1, k2, k3, k4 = jax.random.split(key, 4)

    # Module defaults use initial_scale=0; pick a non-zero value so the multiply
    # is actually exercised.  gain=0.2 is the module default.
    initial_scale = 0.5
    gain = 0.2
    alpha = jnp.float32(initial_scale)          # torch.ones(()) * initial_scale

    # Case 1: small NCHW conv activation; size is a multiple of 128 -> no-pad
    # fast path, single full-array block.
    x1 = jax.random.normal(k1, (2, 4, 16, 16), dtype=jnp.float32)
    out1 = jax.block_until_ready(skipper_forward(x1, alpha, gain, min_pallas_elems=0))
    ref1 = x1 * alpha * jnp.float32(gain)
    assert out1.shape == x1.shape and out1.dtype == x1.dtype
    assert jnp.allclose(out1, ref1, rtol=1e-6, atol=1e-6)

    # Case 2: medium activation (128 KiB) -> split into >=2 even row-tiles so
    # both v7x TensorCores get work.
    x2 = jax.random.normal(k2, (2, 4, 64, 64), dtype=jnp.float32)
    out2 = jax.block_until_ready(skipper_forward(x2, alpha, gain, min_pallas_elems=0))
    ref2 = x2 * alpha * jnp.float32(gain)
    assert out2.shape == x2.shape and out2.dtype == x2.dtype
    assert jnp.allclose(out2, ref2, rtol=1e-6, atol=1e-6)

    # Case 3: awkward size (not a multiple of 128) -> single-pass XLA fallback.
    x3 = jax.random.normal(k3, (2, 3, 5, 7), dtype=jnp.float32)
    out3 = jax.block_until_ready(skipper_forward(x3, alpha, gain, min_pallas_elems=0))
    ref3 = x3 * alpha * jnp.float32(gain)
    assert out3.shape == x3.shape and out3.dtype == x3.dtype
    assert jnp.allclose(out3, ref3, rtol=1e-6, atol=1e-6)

    # Case 4: bf16 input (f32 multiply, single rounding into bf16 output).
    x4 = jax.random.normal(k4, (2, 4, 16, 16), dtype=jnp.bfloat16)
    out4 = jax.block_until_ready(skipper_forward(x4, alpha, gain, min_pallas_elems=0))
    ref4 = (x4.astype(jnp.float32) * alpha * jnp.float32(gain)).astype(jnp.bfloat16)
    assert out4.shape == x4.shape and out4.dtype == x4.dtype
    assert jnp.allclose(out4.astype(jnp.float32), ref4.astype(jnp.float32),
                        rtol=2e-2, atol=2e-2)

    print("KERNEL_OK")
</pallas_src>

<mosaic_0001>
module attributes {stable_mosaic.version = 11 : i64} {
  func.func @_skipper_kernel(%arg0: i32, %arg1: memref<1xf32, #tpu.memory_space<smem>>, %arg2: memref<2x1024xf32, #tpu.memory_space<vmem>>, %arg3: memref<2x1024xf32, #tpu.memory_space<vmem>>) attributes {dimension_semantics = [#tpu.dimension_semantics<parallel>], iteration_bounds = array<i64: 1>, scalar_prefetch = 0 : i64, scratch_operands = 0 : i64, tpu.core_type = #tpu.core_type<tc>, window_params = [{transform_indices = @transform_0, window_bounds = array<i64: 1>}, {transform_indices = @transform_1, window_bounds = array<i64: 2, 1024>}, {transform_indices = @transform_2, window_bounds = array<i64: 2, 1024>}]} {
    %c0 = arith.constant 0 : index
    %c0_0 = arith.constant 0 : index
    %0 = vector.load %arg2[%c0, %c0_0] : memref<2x1024xf32, #tpu.memory_space<vmem>>, vector<2x1024xf32>
    %c0_1 = arith.constant 0 : index
    %1 = memref.load %arg1[%c0_1] : memref<1xf32, #tpu.memory_space<smem>>
    %2 = vector.broadcast %1 : f32 to vector<2x1024xf32>
    %3 = arith.mulf %0, %2 : vector<2x1024xf32>
    %c0_2 = arith.constant 0 : index
    %c0_3 = arith.constant 0 : index
    %4 = vector.load %arg3[%c0_2, %c0_3] : memref<2x1024xf32, #tpu.memory_space<vmem>>, vector<2x1024xf32>
    tpu.vector_store %arg3[%c0_2, %c0_3], %3 {strides = array<i32>} : memref<2x1024xf32, #tpu.memory_space<vmem>>, vector<2x1024xf32>,
    return
  }
  func.func @transform_0(%arg0: i32) -> i32 {
    %c0_i32 = arith.constant 0 : i32
    %c0_i32_0 = arith.constant 0 : i32
    return %c0_i32 : i32
  }
  func.func @transform_1(%arg0: i32) -> (i32, i32) {
    %c0_i32 = arith.constant 0 : i32
    %c0_i32_0 = arith.constant 0 : i32
    return %arg0, %c0_i32 : i32, i32
  }
  func.func @transform_2(%arg0: i32) -> (i32, i32) {
    %c0_i32 = arith.constant 0 : i32
    %c0_i32_0 = arith.constant 0 : i32
    return %arg0, %c0_i32 : i32, i32
  }
}

</mosaic_0001>

<bundles_post_ra>
// kernel: tpu_custom_call.1
= control target key start
LH: loop header
LB: loop body
LE: loop exit
PB: predicated region body
PF: predicated region fallthrough
CT: control target
= control target key end

     0   :  { %8 = vsyncpa [#allocation4], 0  ;;  %s120_s0 = inlined_call_operand.<no memory space> [shape: f32[1], index: 0, kind: input, shape index: {}]   ;;  %s121_s1 = inlined_call_operand.hbm [shape: f32[2,1024], index: 1, kind: input, shape index: {}]   ;;  %s122_s2 = inlined_call_operand.hbm [shape: f32[2,1024], index: 2, kind: output, shape index: {}]  }
   0x1   :  { %9 = vsyncpa [#allocation5], 0  ;;  %s94_s9 = smov [#allocation3]  }
   0x2   :  { %s18_s10 = sshll.u32 %s94_s9, 4  ;;  %s19_s10 = int_to_ptr.vmem [resolvable:$true] %s18_s10 }
   0x3   :  { %s58_s11 = scalar_lea.vmem %s19_s10, 256  ;;  %p63_p1 = scmp.lt.s32.totalorder %s19_s10, %s19_s10 }
   0x4   :  { %p59_p0 = scmp.ne.s32.totalorder %s19_s10, %s58_s11  ;;  %p64_p2 = scmp.lt.s32.totalorder %s58_s11, %s58_s11 }
   0x6   :  { %p65_p3 = por %p64_p2, %p63_p1 }
   0x8   :  { %p66_p4 = pnand %p65_p3, %p59_p0 }
   0xa   :  { %69 = shalt.err (!%p66_p4)
}
   0xb   :  { %21 = dma.hbm_to_vmem [thread:$0]  %s121_s1, 256, %s19_s10, [#allocation4]  }
   0xc   :  { %90 = dma.done.wait [#allocation4], 256  }
   0xd   :  { %91 = vsyncadd [#allocation4], 4294967040  ;;  %v28_v0 = vstv %s120_s0  ;;  %s95_s16 = smov [#allocation6]   ;;  %v25_v1 = vld [vmem:[#allocation3] sm:$0xff]  ;;  %v26_v2 = vld [vmem:[#allocation3 + $0x8] sm:$0xff] }
   0xe   :  { %s39_s17 = sshll.u32 %s95_s16, 4  ;;  %v29_v3 = vmul.f32 %v28_v0, %v25_v1  ;;  %v30_v4 = vmul.f32 %v28_v0, %v26_v2  ;;  %s40_s17 = int_to_ptr.vmem [resolvable:$true] %s39_s17 }
   0xf   :  { %s70_s18 = scalar_lea.vmem %s40_s17, 256  ;;  %p75_p6 = scmp.lt.s32.totalorder %s40_s17, %s40_s17 }
  0x10   :  { %31 = vst [vmem:[#allocation6] sm:$0xff] %v29_v3  ;;  %32 = vst [vmem:[#allocation6 + $0x8] sm:$0xff] %v30_v4  ;;  %p71_p5 = scmp.ne.s32.totalorder %s40_s17, %s70_s18  ;;  %p76_p7 = scmp.lt.s32.totalorder %s70_s18, %s70_s18 }
  0x12   :  { %p77_p8 = por %p76_p7, %p75_p6 }
  0x14   :  { %p78_p9 = pnand %p77_p8, %p71_p5 }
  0x16   :  { %81 = shalt.err (!%p78_p9)
}
  0x17   :  { %42 = dma.vmem_to_hbm [thread:$0]  %s40_s17, 256, %s122_s2, [#allocation5]  }
  0x18   :  { %92 = dma.done.wait [#allocation5], 256  }
  0x19   :  { %93 = vsyncadd [#allocation5], 4294967040 }
  0x1a   :  { %46 = vsyncpa [#allocation4], 1 }
  0x1b   :  { %47 = vsyncpa [#allocation5], 1 }

</bundles_post_ra>
